<compile_context>
chip_gen: v7x
topology: tpu7x:2x2x1
jax: 0.10.0
libtpu: 0.0.40
codegen_flags: <defaults>
</compile_context>

<pallas_src>
import functools

import jax
import jax.numpy as jnp
from jax.experimental import pallas as pl
from jax.experimental.pallas import tpu as pltpu


# ---------------------------------------------------------------------------
# Kernels
# ---------------------------------------------------------------------------
def _conv1d_kernel(x_ref, w_ref, b_ref, o_ref):
    """Whole-K: one MXU matmul per (tm, tn) output tile, bias fused in."""
    acc = jnp.dot(x_ref[...], w_ref[...], preferred_element_type=jnp.float32)
    o_ref[...] = (acc + b_ref[...].astype(jnp.float32)).astype(o_ref.dtype)


def _conv1d_kernel_ksplit(x_ref, w_ref, b_ref, o_ref, acc_ref):
    """K-tiled fallback: accumulate over grid axis 2; bias folded into init."""
    k = pl.program_id(2)

    @pl.when(k == 0)
    def _():
        acc_ref[...] = jnp.broadcast_to(
            b_ref[...].astype(jnp.float32), acc_ref.shape
        )

    acc_ref[...] += jnp.dot(
        x_ref[...], w_ref[...], preferred_element_type=jnp.float32
    )

    @pl.when(k == pl.num_programs(2) - 1)
    def _():
        o_ref[...] = acc_ref[...].astype(o_ref.dtype)


# ---------------------------------------------------------------------------
# Helpers
# ---------------------------------------------------------------------------
def _round_up(x, m):
    return ((x + m - 1) // m) * m


def _largest_div_multiple(dim, cap, unit):
    """Largest t <= cap with t % unit == 0 and dim % t == 0, else None."""
    t = (min(cap, dim) // unit) * unit
    while t >= unit:
        if dim % t == 0:
            return t
        t -= unit
    return None


_VMEM_TILE_BUDGET = 26 << 20     # conservative: fits v5e/v6e/v7x scoped VMEM
_SMALL_PROBLEM_FLOPS = 1 << 22   # below this, plain XLA dot beats pallas overhead


# ---------------------------------------------------------------------------
# Forward
# ---------------------------------------------------------------------------
@functools.partial(
    jax.jit, static_argnames=("tm", "tn", "tk", "force_pallas", "split_k")
)
def conv1d_forward(x, w, b, *, tm=256, tn=256, tk=2048,
                   force_pallas=False, split_k=None):
    """Pallas implementation of Conv1D.forward: y = x @ w + b on last axis."""
    n_in, n_out = w.shape
    lead = x.shape[:-1]
    x2 = x.reshape(-1, n_in)
    M = x2.shape[0]

    # torch: addmm(b.type_as(x), x.view(-1, n_in), w.type_as(x))
    w = w.astype(x.dtype)
    b = b.astype(x.dtype)

    # Tiny problems: pallas_call fixed overhead dwarfs compute; let XLA fuse.
    if not force_pallas and (2 * M * n_in * n_out) < _SMALL_PROBLEM_FLOPS:
        return (x2 @ w + b).reshape(*lead, n_out)

    in_bytes = x.dtype.itemsize
    out_bytes = in_bytes

    # ---- M tiling: pad only M (cheap); keep K / N unpadded. ----
    sub = 16 if x.dtype == jnp.bfloat16 else 8
    tm_eff = min(tm, _round_up(M, sub))
    Mp = _round_up(M, tm_eff)
    if Mp != M:
        x2 = jnp.pad(x2, ((0, Mp - M), (0, 0)))

    # ---- N tiling: multiple-of-128 divisor of n_out, else one full-N block. ----
    tn_eff = _largest_div_multiple(n_out, tn, 128) or n_out

    # ---- K: whole-K strip per tile unless VMEM budget says otherwise. ----
    tk_div = _largest_div_multiple(n_in, tk, 128)
    wholek_vmem = (2 * (tm_eff * n_in + n_in * tn_eff) * in_bytes
                   + 2 * tm_eff * tn_eff * out_bytes)
    if split_k is None:
        use_split = (wholek_vmem > _VMEM_TILE_BUDGET) and tk_div is not None
    else:
        use_split = bool(split_k) and tk_div is not None

    b2 = b.reshape(1, n_out)

    cost = pl.CostEstimate(
        flops=2 * M * n_in * n_out,
        transcendentals=0,
        bytes_accessed=(M * n_in + n_in * n_out) * in_bytes
        + M * n_out * out_bytes,
    )
    cparams_kwargs = dict(vmem_limit_bytes=48 << 20)

    if not use_split:
        grid = (Mp // tm_eff, n_out // tn_eff)
        out_p = pl.pallas_call(
            _conv1d_kernel,
            out_shape=jax.ShapeDtypeStruct((Mp, n_out), x.dtype),
            grid_spec=pltpu.PrefetchScalarGridSpec(
                num_scalar_prefetch=0,
                grid=grid,
                in_specs=[
                    pl.BlockSpec((tm_eff, n_in), lambda i, j: (i, 0)),   # x
                    pl.BlockSpec((n_in, tn_eff), lambda i, j: (0, j)),   # w
                    pl.BlockSpec((1, tn_eff), lambda i, j: (0, j)),      # bias
                ],
                out_specs=pl.BlockSpec((tm_eff, tn_eff), lambda i, j: (i, j)),
            ),
            compiler_params=pltpu.CompilerParams(
                dimension_semantics=("parallel", "parallel"), **cparams_kwargs
            ),
            cost_estimate=cost,
        )(x2, w, b2)
    else:
        tk_eff = tk_div
        grid = (Mp // tm_eff, n_out // tn_eff, n_in // tk_eff)
        out_p = pl.pallas_call(
            _conv1d_kernel_ksplit,
            out_shape=jax.ShapeDtypeStruct((Mp, n_out), x.dtype),
            grid_spec=pltpu.PrefetchScalarGridSpec(
                num_scalar_prefetch=0,
                grid=grid,
                in_specs=[
                    pl.BlockSpec((tm_eff, tk_eff), lambda i, j, k: (i, k)),  # x
                    pl.BlockSpec((tk_eff, tn_eff), lambda i, j, k: (k, j)),  # w
                    pl.BlockSpec((1, tn_eff), lambda i, j, k: (0, j)),       # b
                ],
                out_specs=pl.BlockSpec((tm_eff, tn_eff), lambda i, j, k: (i, j)),
                scratch_shapes=[pltpu.VMEM((tm_eff, tn_eff), jnp.float32)],
            ),
            compiler_params=pltpu.CompilerParams(
                dimension_semantics=("parallel", "parallel", "arbitrary"),
                **cparams_kwargs,
            ),
            cost_estimate=cost,
        )(x2, w, b2)

    out = out_p[:M] if Mp != M else out_p
    return out.reshape(*lead, n_out)


# ---------------------------------------------------------------------------
# Parameter init matching the PyTorch module's __init__
# ---------------------------------------------------------------------------
def init_conv1d_params(key, n_in, n_out, zero_out=False, init_scale=1.0,
                       dtype=jnp.float32):
    if zero_out:
        w = jnp.zeros((n_in, n_out), dtype=dtype)
    else:
        w = (0.02 * init_scale) * jax.random.normal(key, (n_in, n_out),
                                                    dtype=dtype)
    b = jnp.zeros((n_out,), dtype=dtype)
    return w, b


if __name__ == "__main__":
    key = jax.random.PRNGKey(0)
    k_w, k_x = jax.random.split(key)

    # Shapes sized so the Pallas (whole-K, single-matmul-per-tile) path runs.
    batch, seq, n_in, n_out = 2, 64, 256, 384
    w, b = init_conv1d_params(k_w, n_in, n_out, zero_out=False, init_scale=1.0)
    x = jax.random.normal(k_x, (batch, seq, n_in), dtype=jnp.float32)

    y_ref = (x.reshape(-1, n_in) @ w + b).reshape(batch, seq, n_out)

    # 1) whole-K Pallas kernel
    y = jax.block_until_ready(conv1d_forward(x, w, b, force_pallas=True))
    assert y.shape == (batch, seq, n_out), y.shape
    assert jnp.allclose(y, y_ref, atol=1e-4, rtol=1e-4)

    # 2) K-split accumulator kernel (exercised explicitly with small tk)
    y2 = jax.block_until_ready(
        conv1d_forward(x, w, b, tk=128, force_pallas=True, split_k=True))
    assert jnp.allclose(y2, y_ref, atol=1e-4, rtol=1e-4)

    # 3) tiny-problem fallback (plain fused XLA dot)
    xs = jax.random.normal(k_x, (2, 8, n_in), dtype=jnp.float32)
    ys = jax.block_until_ready(conv1d_forward(xs, w, b))
    ys_ref = (xs.reshape(-1, n_in) @ w + b).reshape(2, 8, n_out)
    assert jnp.allclose(ys, ys_ref, atol=1e-4, rtol=1e-4)

    print("KERNEL_OK")
</pallas_src>

<mosaic_0001>
module attributes {stable_mosaic.version = 11 : i64} {
  func.func @_conv1d_kernel(%arg0: i32, %arg1: i32, %arg2: memref<128x256xf32, #tpu.memory_space<vmem>>, %arg3: memref<256x128xf32, #tpu.memory_space<vmem>>, %arg4: memref<1x128xf32, #tpu.memory_space<vmem>>, %arg5: memref<128x128xf32, #tpu.memory_space<vmem>>) attributes {dimension_semantics = [#tpu.dimension_semantics<parallel>, #tpu.dimension_semantics<parallel>], iteration_bounds = array<i64: 1, 3>, scalar_prefetch = 0 : i64, scratch_operands = 0 : i64, tpu.core_type = #tpu.core_type<tc>, window_params = [{transform_indices = @transform_0, window_bounds = array<i64: 128, 256>}, {transform_indices = @transform_1, window_bounds = array<i64: 256, 128>}, {transform_indices = @transform_2, window_bounds = array<i64: 1, 128>}, {transform_indices = @transform_3, window_bounds = array<i64: 128, 128>}]} {
    %c0 = arith.constant 0 : index
    %c0_0 = arith.constant 0 : index
    %0 = vector.load %arg2[%c0, %c0_0] : memref<128x256xf32, #tpu.memory_space<vmem>>, vector<128x256xf32>
    %c0_1 = arith.constant 0 : index
    %c0_2 = arith.constant 0 : index
    %1 = vector.load %arg3[%c0_1, %c0_2] : memref<256x128xf32, #tpu.memory_space<vmem>>, vector<256x128xf32>
    %cst = arith.constant dense<0.000000e+00> : vector<128x128xf32>
    %2 = tpu.matmul %0, %1, %cst {dimension_numbers = #tpu.dot_dimension_numbers<[1], [0], [0], [1], [0, 0, 1, 1], [], []>} : vector<128x256xf32>, vector<256x128xf32>, vector<128x128xf32> -> vector<128x128xf32>
    %c0_3 = arith.constant 0 : index
    %c0_4 = arith.constant 0 : index
    %3 = vector.load %arg4[%c0_3, %c0_4] : memref<1x128xf32, #tpu.memory_space<vmem>>, vector<1x128xf32>
    %4 = vector.broadcast %3 : vector<1x128xf32> to vector<128x128xf32>
    %5 = arith.addf %2, %4 : vector<128x128xf32>
    %c0_5 = arith.constant 0 : index
    %c0_6 = arith.constant 0 : index
    %6 = vector.load %arg5[%c0_5, %c0_6] : memref<128x128xf32, #tpu.memory_space<vmem>>, vector<128x128xf32>
    tpu.vector_store %arg5[%c0_5, %c0_6], %5 {strides = array<i32>} : memref<128x128xf32, #tpu.memory_space<vmem>>, vector<128x128xf32>,
    return
  }
  func.func @transform_0(%arg0: i32, %arg1: i32) -> (i32, i32) {
    %c0_i32 = arith.constant 0 : i32
    %c0_i32_0 = arith.constant 0 : i32
    return %arg0, %c0_i32 : i32, i32
  }
  func.func @transform_1(%arg0: i32, %arg1: i32) -> (i32, i32) {
    %c0_i32 = arith.constant 0 : i32
    %c0_i32_0 = arith.constant 0 : i32
    return %c0_i32, %arg1 : i32, i32
  }
  func.func @transform_2(%arg0: i32, %arg1: i32) -> (i32, i32) {
    %c0_i32 = arith.constant 0 : i32
    %c0_i32_0 = arith.constant 0 : i32
    return %c0_i32, %arg1 : i32, i32
  }
  func.func @transform_3(%arg0: i32, %arg1: i32) -> (i32, i32) {
    %c0_i32 = arith.constant 0 : i32
    return %arg0, %arg1 : i32, i32
  }
}

</mosaic_0001>

<bundles_post_ra>
// kernel: conv1d_forward.1
= control target key start
LH: loop header
LB: loop body
LE: loop exit
PB: predicated region body
PF: predicated region fallthrough
CT: control target
= control target key end

     0   :  { %8 = vsyncpa [#allocation3], 0  ;;  %s1286_s0 = inlined_call_operand.hbm [shape: f32[128,256], index: 0, kind: input, shape index: {}]   ;;  %s1287_s1 = inlined_call_operand.hbm [shape: f32[256,384], index: 1, kind: input, shape index: {}]   ;;  %s1288_s2 = inlined_call_operand.vmem [shape: f32[1,384], index: 2, kind: input, shape index: {}]   ;;  %s1289_s3 = inlined_call_operand.hbm [shape: f32[128,384], index: 3, kind: output, shape index: {}]  }
   0x1   :  { %9 = vsyncpa [#allocation6], 0 }
   0x2   :  { %11 = vsyncpa [#allocation6 + $0x1], 0 }
   0x3   :  { %12 = vsyncpa [#allocation4], 0 }
   0x4   :  { %14 = vsyncpa [#allocation4 + $0x1], 0  ;;  %s998_s12 = smov 0   ;;  %s1000_s13 = smov 0  }
   0x5   :  { %s1002_s14 = smov 0   ;;  %s1004_s15 = smov 0  }
   0x6   :  { %s1006_s16 = smov 0   ;;  %s1008_s17 = smov 0  }
   0x7 LB: > { %s596_s18 = sadd.s32 4294967295, %s965_s17   ;;  %s597_s19 = sadd.s32 4294967294, %s965_s17   ;;  %s965_s17 = sphi %s1008_s17, %s20_s17   ;;  %s961_s16 = sphi %s1006_s16, %s1314_s16   ;;  %s957_s15 = sphi %s1004_s15, %s1313_s15   ;;  %s953_s14 = sphi %s1002_s14, %s1312_s14   ;;  %s949_s13 = sphi %s1000_s13, %s1311_s13   ;;  %s945_s12 = sphi %s998_s12, %s1310_s12  }
   0x8   : > { %p72_p0 = scmp.ne.s32.totalorder %s953_s14, %s949_s13  ;;  %p73_p1 = scmp.eq.s32.totalorder %s965_s17, 0 }
   0x9   : > { %p78_p2 = scmp.ne.s32.totalorder %s949_s13, %s945_s12  ;;  %p1035_p3 = scmp.eq.s32.totalorder %s596_s18, 0 }
   0xa   : > { %p1039_p4 = por %p73_p1, %p72_p0  ;;  %p130_p5 = scmp.eq.s32.totalorder %s596_s18, 2 }
   0xb   : > { %s1296_s20 = scalar_select %p1035_p3, 1, 0 }
   0xc   : > { %p1045_p6 = por %p1035_p3, %p78_p2  ;;  %p136_p7 = scmp.eq.s32.totalorder %s597_s19, 2 }
   0xd   : > { %p1049_p8 = por %p130_p5, %p72_p0  ;;  %p598_p9 = scmp.ge.s32.totalorder %s965_s17, 1 }
   0xe   : > { %s1298_s22 = scalar_select %p1045_p6, 1, 0 }
   0xf   : > { %s1299_s23 = scalar_select %p1049_p8, 1, 0 }
  0x10   : > { %p1054_p10 = por %p136_p7, %p78_p2  ;;  %p143_p11 = scmp.lt.s32.totalorder %s965_s17, 4 }
  0x11   : > { %s967_s26 = smov [#allocation2]   ;;  %p761_p0 = scmp.lt.s32.totalorder %s965_s17, 3 }
  0x12   : > { %s1300_s24 = scalar_select %p1054_p10, 1, 0 }
  0x13   : > { %p1059_p12 = pnand %p598_p9, %p143_p11  ;;  %s159_s27 = sshll.u32 %s967_s26, 4  ;;  %s160_s27 = int_to_ptr.vmem [resolvable:$true] %s159_s27 }
  0x14   : > { %p1074_p2 = pnand %p761_p0, %p1039_p4  ;;  %s29_s30 = sadd.s32 1, %s961_s16 }
  0x15   : > { %s1301_s25 = scalar_select %p1059_p12, 1, 0 }
  0x16   : > { %p748_p13 = pneg %p1059_p12  ;;  %s821_s6 = scalar_lea.hbm %s1286_s0, 4096 }
  0x17   : > { %s1303_s29 = scalar_select %p1074_p2, 1, 0 }
  0x18   : > { %p1068_p1 = pnand %p748_p13, %p1035_p3  ;;  %p822_p5 = scmp.ne.s32.totalorder %s1286_s0, %s821_s6 }
  0x19   : > { %p828_p4 = scmp.lt.u32.totalorder %s821_s6, %s1286_s0 }
  0x1a   : > { %p823_p7 = pneg %p1068_p1 }
  0x1c   : > { %p824_p9 = pnand %p823_p7, %p822_p5 }
  0x1e   : > { %p825_p11 = pneg %p824_p9 }
  0x20   : > { %p830_p13 = pnand %p828_p4, %p825_p11 }
  0x22   : > { %833 = shalt.err (!%p830_p13)
}
  0x23   : > { %s834_s11 = scalar_lea.vmem %s160_s27, 4096  ;;  %p842_p6 = scmp.lt.s32.totalorder %s160_s27, %s160_s27 }
  0x24   : > { %p835_p0 = scmp.ne.s32.totalorder %s160_s27, %s834_s11  ;;  %p843_p3 = scmp.lt.s32.totalorder %s834_s11, %s834_s11 }
  0x26   : > { %p837_p10 = pnand %p835_p0, %p823_p7  ;;  %p844_p12 = por %p843_p3, %p842_p6 }
  0x28   : > { %p838_p8 = pneg %p837_p10 }
  0x2a   : > { %p845_p2 = pnand %p844_p12, %p838_p8 }
  0x2c   : > { %848 = shalt.err (!%p845_p2)
}
  0x2d   : > { %s968_s18 = smov 256   ;;  %s969_s19 = smov 16  }
  0x2e   : > { %751 = dma.hbm_to_vmem [thread:$0]  (!%p1068_p1), %s1286_s0, 4096, %s160_s27, [#allocation3], %s968_s18, %s968_s18, %s969_s19  }
  0x2f   : > { %p30_p5 = scmp.ge.s32.totalorder %s29_s30, 3  ;;  %s65_s4 = sadd.s32 1, %s953_s14 }
  0x30   : > { %s173_s5 = sand.u32 1, %s953_s14   ;;  %s602_s8 = sshll.u32 %s961_s16, 7 }
  0x31   : > { %s1316_s30 = smov (%p30_p5, %s29_s30), 0  ;;  %s601_s6 = sshll.u32 %s173_s5, 8 }
  0x32   : > { %s62_s7 = ssub.s32 %s961_s16, %s1316_s30  ;;  %s1105_s28 = scalar_lea.hbm %s1287_s1, %s602_s8 }
  0x33   : > { %p63_p3 = scmp.eq.s32.totalorder %s62_s7, 0  ;;  %s177_s27 = scalar_lea.vmem [#allocation5], %s601_s6 }
  0x34   : > { %s183_s11 = sshll.u32 %s177_s27, 4  ;;  %s1112_s19 = scalar_lea.sflag [#allocation6], %s173_s5  ;;  %s1110_s11 = int_to_ptr.vmem [resolvable:$true] %s183_s11 }
  0x35   : > { %s1108_s18 = scalar_select %p63_p3, %s953_s14, %s65_s4  }
  0x36   : > { %s849_s21 = scalar_lea.hbm %s1105_s28, 4096  ;;  %p1304_p8 = scmp.ne.s32.totalorder %s1303_s29, 0 }
  0x37   : > { %p850_p6 = scmp.ne.s32.totalorder %s1105_s28, %s849_s21  ;;  %s854_s8 = scalar_lea.hbm %s1287_s1, 12288 }
  0x38   : > { %p851_p10 = pneg %p1304_p8  ;;  %p855_p2 = scmp.lt.u32.totalorder %s1105_s28, %s1287_s1 }
  0x39   : > { %p856_p7 = scmp.lt.u32.totalorder %s854_s8, %s849_s21  ;;  %p858_p11 = scmp.lt.u32.totalorder %s849_s21, %s1105_s28 }
  0x3a   : > { %p852_p12 = pnand %p851_p10, %p850_p6 }
  0x3b   : > { %p857_p9 = por %p856_p7, %p855_p2 }
  0x3c   : > { %p853_p1 = pneg %p852_p12 }
  0x3d   : > { %p859_p4 = por %p858_p11, %p857_p9 }
  0x3f   : > { %p860_p13 = pnand %p859_p4, %p853_p1 }
  0x41   : > { %863 = shalt.err (!%p860_p13)
}
  0x42   : > { %s864_s4 = scalar_lea.vmem %s1110_s11, 4096  ;;  %s970_s5 = smov [#allocation5]  }
  0x43   : > { %p865_p0 = scmp.ne.s32.totalorder %s1110_s11, %s864_s4  ;;  %s869_s10 = sshll.u32 %s970_s5, 4  ;;  %s870_s10 = int_to_ptr.vmem [resolvable:$false] %s869_s10 }
  0x44   : > { %s871_s27 = scalar_lea.vmem %s870_s10, 8192  ;;  %p872_p6 = scmp.lt.s32.totalorder %s1110_s11, %s870_s10 }
  0x45   : > { %p867_p5 = pnand %p865_p0, %p851_p10  ;;  %p873_p12 = scmp.lt.s32.totalorder %s871_s27, %s864_s4 }
  0x47   : > { %p868_p3 = pneg %p867_p5  ;;  %p874_p2 = por %p873_p12, %p872_p6 }
  0x49   : > { %p875_p7 = pnand %p874_p2, %p868_p3 }
  0x4b   : > { %878 = shalt.err (!%p875_p7)
}
  0x4c   : > { %s971_s21 = smov 384   ;;  %s972_s26 = smov 128  }
  0x4d   : > { %s973_s7 = smov 8   ;;  %p1305_p10 = scmp.ne.s32.totalorder %s1301_s25, 0 }
  0x4e   : > { %755 = dma.hbm_to_vmem [thread:$0]  (!%p1304_p8), %s1105_s28, 4096, %s1110_s11, %s1112_s19, %s971_s21, %s972_s26, %s973_s7  }
  0x4f   : > { %201 = sbr.rel (%p1305_p10) target bundleno = 387 (0x183), region = 32  ;;  %p1306_p1 = scmp.ne.s32.totalorder (!%p1305_p10), %s1296_s20, 0 }
  0x56   : > { %932 = dma.done.wait (%p1306_p1), [#allocation3], 4096  }
  0x57   : > { %934 = vsyncadd (%p1306_p1), [#allocation3], 4294963200  ;;  %s1147_s8 = sand.u32 1, %s949_s13   ;;  %p1307_p8 = scmp.ne.s32.totalorder %s1298_s22, 0 }
  0x58   : > { %s605_s6 = sshll.u32 %s1147_s8, 8  ;;  %s208_s9 = scalar_lea.sflag [#allocation6], %s1147_s8 }
  0x59   : > { %s1151_s4 = scalar_lea.vmem [#allocation5], %s605_s6 }
  0x5a   : > { %936 = dma.done.wait (%p1307_p8), %s208_s9, 4096  }
  0x5b   : > { %938 = vsyncadd (%p1307_p8), %s208_s9, 4294963200  ;;  %v290_v0 = vld [vmem:[%s1151_s4 + $0x80] sm:$0xff]  ;;  %v291_v1 = vld [vmem:[%s1151_s4 + $0x88] sm:$0xff]  ;;  %p238_p9 = scmp.lt.s32.totalorder %s957_s15, 2  ;;  %s606_s28 = sshll.u32 %s1147_s8, 7 }
  0x5c   : > { %v274_v2 = vld [vmem:[%s1151_s4] sm:$0xff]  ;;  %v692_v3 = vpack.c.bf16 %v291_v1, %v290_v0  ;;  %v275_v4 = vld [vmem:[%s1151_s4 + $0x8] sm:$0xff]  ;;  %v292_v5 = vld [vmem:[%s1151_s4 + $0x90] sm:$0xff]  ;;  %s1199_s11 = scalar_lea.vmem [#allocation7], %s606_s28  ;;  %s609_s19 = sshll.u32 %s957_s15, 7 }
  0x5d   : > { %v293_v6 = vld [vmem:[%s1151_s4 + $0x98] sm:$0xff]  ;;  %v694_v7 = vpack.c.bf16 %v275_v4, %v274_v2  ;;  %v276_v9 = vld [vmem:[%s1151_s4 + $0x10] sm:$0xff]  ;;  %v294_v11 = vld [vmem:[%s1151_s4 + $0xa0] sm:$0xff]  ;;  %s239_s20 = scalar_select %p238_p9, %s957_s15, 2 }
  0x5e   : > { %v696_v8 = vpack.c.bf16 %v293_v6, %v292_v5  ;;  %v277_v10 = vld [vmem:[%s1151_s4 + $0x18] sm:$0xff]  ;;  %693 = vmatprep.subr.bf16.mxu0 %v692_v3  ;;  %724 = vmatprep.subr.bf16.mxu1 %v692_v3  ;;  %v295_v12 = vld [vmem:[%s1151_s4 + $0xa8] sm:$0xff]  ;;  %v278_v15 = vld [vmem:[%s1151_s4 + $0x20] sm:$0xff]  ;;  %s490_s5 = sshll.u32 %s1199_s11, 4  ;;  %s1232_s15 = scalar_lea.hbm %s1289_s3, %s609_s19  ;;  %s1234_s5 = int_to_ptr.vmem [resolvable:$true] %s490_s5 }
  0x5f   : > { %695 = vmatpush3.bf16.msra.mxu0 %v694_v7  ;;  %732 = vmatpush3.bf16.msra.mxu1 %v694_v7  ;;  %v698_v13 = vpack.c.bf16 %v277_v10, %v276_v9  ;;  %v700_v14 = vpack.c.bf16 %v295_v12, %v294_v11  ;;  %v279_v16 = vld [vmem:[%s1151_s4 + $0x28] sm:$0xff]  ;;  %v296_v17 = vld [vmem:[%s1151_s4 + $0xb0] sm:$0xff]  ;;  %v297_v18 = vld [vmem:[%s1151_s4 + $0xb8] sm:$0xff]  ;;  %s240_s29 = scalar_lea.vmem %s1288_s2, %s239_s20  ;;  %s475_s21 = scalar_lea.sflag [#allocation4], %s1147_s8 }
  0x60   : > { %697 = vmatprep.subr.bf16.mxu0 %v696_v8  ;;  %725 = vmatprep.subr.bf16.mxu1 %v696_v8  ;;  %v702_v19 = vpack.c.bf16 %v279_v16, %v278_v15  ;;  %v704_v20 = vpack.c.bf16 %v297_v18, %v296_v17  ;;  %v280_v21 = vld [vmem:[%s1151_s4 + $0x30] sm:$0xff]  ;;  %v281_v22 = vld [vmem:[%s1151_s4 + $0x38] sm:$0xff]  ;;  %v298_v23 = vld [vmem:[%s1151_s4 + $0xc0] sm:$0xff]  ;;  %s879_s26 = scalar_lea.vmem %s1234_s5, 2048  ;;  %p1308_p4 = scmp.ne.s32.totalorder %s1299_s23, 0 }
  0x61   : > { %v299_v24 = vld [vmem:[%s1151_s4 + $0xc8] sm:$0xff]  ;;  %v706_v27 = vpack.c.bf16 %v281_v22, %v280_v21  ;;  %v282_v29 = vld [vmem:[%s1151_s4 + $0x40] sm:$0xff]  ;;  %v300_v31 = vld [vmem:[%s1151_s4 + $0xd0] sm:$0xff]  ;;  %p880_p11 = scmp.ne.s32.totalorder %s1234_s5, %s879_s26  ;;  %s974_s7 = smov [#allocation7]  }
  0x62   : > { %v243_v25 = vld [vmem:[#allocation2 + $0x8] sm:$0xff]  ;;  %v708_v28 = vpack.c.bf16 %v299_v24, %v298_v23  ;;  %v301_v32 = vld [vmem:[%s1151_s4 + $0xd8] sm:$0xff]  ;;  %v284_v35 = vld [vmem:[%s1151_s4 + $0x50] sm:$0xff]  ;;  %s883_s6 = sshll.u32 %s974_s7, 4  ;;  %s884_s6 = int_to_ptr.vmem [resolvable:$false] %s883_s6 }
  0x63   : > { %699 = vmatpush3.bf16.msra.mxu0 %v698_v13  ;;  %733 = vmatpush3.bf16.msra.mxu1 %v698_v13  ;;  %v259_v26 = vld [vmem:[#allocation2 + $0x88] sm:$0xff]  ;;  %v712_v34 = vpack.c.bf16 %v301_v32, %v300_v31  ;;  %v285_v36 = vld [vmem:[%s1151_s4 + $0x58] sm:$0xff]  ;;  %v302_v37 = vld [vmem:[%s1151_s4 + $0xe0] sm:$0xff]  ;;  %p881_p13 = pnand %p880_p11, %p1308_p4  ;;  %s885_s9 = scalar_lea.vmem %s884_s6, 4096 }
  0x64   : > { %701 = vmatprep.subr.bf16.mxu0 %v700_v14  ;;  %726 = vmatprep.subr.bf16.mxu1 %v700_v14  ;;  %v283_v30 = vld [vmem:[%s1151_s4 + $0x48] sm:$0xff]  ;;  %v714_v39 = vpack.c.bf16 %v285_v36, %v284_v35  ;;  %v286_v41 = vld [vmem:[%s1151_s4 + $0x60] sm:$0xff]  ;;  %v304_v43 = vld [vmem:[%s1151_s4 + $0xf0] sm:$0xff]  ;;  %p886_p5 = scmp.lt.s32.totalorder %s1234_s5, %s884_s6  ;;  %p887_p3 = scmp.lt.s32.totalorder %s885_s9, %s879_s26 }
  0x65   : > { %377 = vmatprep.mubr.f32.mxu0 %v243_v25  ;;  %417 = vmatprep.mubr.f32.mxu1 %v259_v26  ;;  %v710_v33 = vpack.c.bf16 %v283_v30, %v282_v29  ;;  %v303_v38 = vld [vmem:[%s1151_s4 + $0xe8] sm:$0xff]  ;;  %v305_v44 = vld [vmem:[%s1151_s4 + $0xf8] sm:$0xff]  ;;  %v288_v47 = vld [vmem:[%s1151_s4 + $0x70] sm:$0xff]  ;;  %p882_p0 = pneg %p881_p13 }
  0x66   : > { %v716_v40 = vpack.c.bf16 %v303_v38, %v302_v37  ;;  %v287_v42 = vld [vmem:[%s1151_s4 + $0x68] sm:$0xff]  ;;  %v720_v46 = vpack.c.bf16 %v305_v44, %v304_v43  ;;  %v289_v48 = vld [vmem:[%s1151_s4 + $0x78] sm:$0xff]  ;;  %v242_v50 = vld [vmem:[#allocation2] sm:$0xff]  ;;  %p888_p6 = por %p887_p3, %p886_p5 }
  0x67   : > { %703 = vmatpush3.bf16.msra.mxu0 %v702_v19  ;;  %734 = vmatpush3.bf16.msra.mxu1 %v702_v19  ;;  %v718_v45 = vpack.c.bf16 %v287_v42, %v286_v41  ;;  %v722_v49 = vpack.c.bf16 %v289_v48, %v288_v47  ;;  %v258_v51 = vld [vmem:[#allocation2 + $0x80] sm:$0xff]  ;;  %v245_v52 = vld [vmem:[#allocation2 + $0x18] sm:$0xff]  ;;  %v244_v54 = vld [vmem:[#allocation2 + $0x10] sm:$0xff] }
  0x68   : > { %705 = vmatprep.subr.bf16.mxu0 %v704_v20  ;;  %727 = vmatprep.subr.bf16.mxu1 %v704_v20  ;;  %v261_v53 = vld [vmem:[#allocation2 + $0x98] sm:$0xff]  ;;  %v260_v55 = vld [vmem:[#allocation2 + $0x90] sm:$0xff]  ;;  %v247_v56 = vld [vmem:[#allocation2 + $0x28] sm:$0xff]  ;;  %p889_p12 = pnand %p888_p6, %p882_p0 }
  0x69   : > { %v263_v57 = vld [vmem:[#allocation2 + $0xa8] sm:$0xff]  ;;  %v246_v58 = vld [vmem:[#allocation2 + $0x20] sm:$0xff]  ;;  %v249_v60 = vld [vmem:[#allocation2 + $0x38] sm:$0xff] }
  0x6a   : > { %v262_v59 = vld [vmem:[#allocation2 + $0xa0] sm:$0xff]  ;;  %v265_v61 = vld [vmem:[#allocation2 + $0xb8] sm:$0xff]  ;;  %v248_v62 = vld [vmem:[#allocation2 + $0x30] sm:$0xff] }
  0x6b   : > { %707 = vmatpush3.bf16.msra.mxu0 %v706_v27  ;;  %735 = vmatpush3.bf16.msra.mxu1 %v706_v27  ;;  %v264_v63 = vld [vmem:[#allocation2 + $0xb0] sm:$0xff]  ;;  %v251_v0 = vld [vmem:[#allocation2 + $0x48] sm:$0xff]  ;;  %v250_v2 = vld [vmem:[#allocation2 + $0x40] sm:$0xff] }
  0x6c   : > { %709 = vmatprep.subr.bf16.mxu0 %v708_v28  ;;  %728 = vmatprep.subr.bf16.mxu1 %v708_v28  ;;  %v267_v1 = vld [vmem:[#allocation2 + $0xc8] sm:$0xff]  ;;  %v266_v3 = vld [vmem:[#allocation2 + $0xc0] sm:$0xff]  ;;  %v253_v4 = vld [vmem:[#allocation2 + $0x58] sm:$0xff] }
  0x6d   : > { %v269_v5 = vld [vmem:[#allocation2 + $0xd8] sm:$0xff]  ;;  %v252_v6 = vld [vmem:[#allocation2 + $0x50] sm:$0xff]  ;;  %v255_v8 = vld [vmem:[#allocation2 + $0x68] sm:$0xff] }
  0x6e   : > { %v268_v7 = vld [vmem:[#allocation2 + $0xd0] sm:$0xff]  ;;  %v271_v9 = vld [vmem:[#allocation2 + $0xe8] sm:$0xff]  ;;  %v254_v10 = vld [vmem:[#allocation2 + $0x60] sm:$0xff] }
  0x6f   : > { %711 = vmatpush3.bf16.msra.mxu0 %v710_v33  ;;  %736 = vmatpush3.bf16.msra.mxu1 %v710_v33  ;;  %v270_v11 = vld [vmem:[#allocation2 + $0xe0] sm:$0xff]  ;;  %v257_v12 = vld [vmem:[#allocation2 + $0x78] sm:$0xff]  ;;  %v256_v14 = vld [vmem:[#allocation2 + $0x70] sm:$0xff] }
  0x70   : > { %713 = vmatprep.subr.bf16.mxu0 %v712_v34  ;;  %729 = vmatprep.subr.bf16.mxu1 %v712_v34  ;;  %v273_v13 = vld [vmem:[#allocation2 + $0xf8] sm:$0xff]  ;;  %v272_v15 = vld [vmem:[#allocation2 + $0xf0] sm:$0xff]  ;;  %v1195_v18 = vld [vmem:[%s240_s29] ss:$0 sm:$0xff] }
  0x73   : > { %715 = vmatpush3.bf16.msra.mxu0 %v714_v39  ;;  %737 = vmatpush3.bf16.msra.mxu1 %v714_v39 }
  0x74   : > { %717 = vmatprep.subr.bf16.mxu0 %v716_v40  ;;  %730 = vmatprep.subr.bf16.mxu1 %v716_v40 }
  0x77   : > { %719 = vmatpush3.bf16.msra.mxu0 %v718_v45  ;;  %738 = vmatpush3.bf16.msra.mxu1 %v718_v45 }
  0x78   : > { %721 = vmatprep.subr.bf16.mxu0 %v720_v46  ;;  %731 = vmatprep.subr.bf16.mxu1 %v720_v46 }
  0x7b   : > { %723 = vmatpush3.bf16.msra.mxu0 %v722_v49  ;;  %739 = vmatpush3.bf16.msra.mxu1 %v722_v49 }
  0x7e   : > { %378 = vmatmul.mubr.f32.vlgmr.msra.gmra.mrb[0].mxu0 %v242_v50  ;;  %418 = vmatmul.mubr.f32.vlgmr.msra.gmra.mrb[0].mxu1 %v258_v51 }
  0x7f   : > { %382 = vmatprep.mubr.f32.mxu0 %v245_v52  ;;  %422 = vmatprep.mubr.f32.mxu1 %v261_v53 }
  0x82   : > { %383 = vmatmul.mubr.f32.gmra.mrb[2].mxu0 %v244_v54  ;;  %423 = vmatmul.mubr.f32.gmra.mrb[2].mxu1 %v260_v55 }
  0x83   : > { %387 = vmatprep.mubr.f32.mxu0 %v247_v56  ;;  %427 = vmatprep.mubr.f32.mxu1 %v263_v57 }
  0x86   : > { %388 = vmatmul.mubr.f32.gmra.mrb[4].mxu0 %v246_v58  ;;  %428 = vmatmul.mubr.f32.gmra.mrb[4].mxu1 %v262_v59 }
  0x87   : > { %392 = vmatprep.mubr.f32.mxu0 %v249_v60  ;;  %432 = vmatprep.mubr.f32.mxu1 %v265_v61 }
  0x8a   : > { %393 = vmatmul.mubr.f32.gmra.mrb[6].mxu0 %v248_v62  ;;  %433 = vmatmul.mubr.f32.gmra.mrb[6].mxu1 %v264_v63 }
  0x8b   : > { %397 = vmatprep.mubr.f32.mxu0 %v251_v0  ;;  %437 = vmatprep.mubr.f32.mxu1 %v267_v1 }
  0x8e   : > { %398 = vmatmul.mubr.f32.gmra.mrb[8].mxu0 %v250_v2  ;;  %438 = vmatmul.mubr.f32.gmra.mrb[8].mxu1 %v266_v3 }
  0x8f   : > { %402 = vmatprep.mubr.f32.mxu0 %v253_v4  ;;  %442 = vmatprep.mubr.f32.mxu1 %v269_v5 }
  0x92   : > { %403 = vmatmul.mubr.f32.gmra.mrb[10].mxu0 %v252_v6  ;;  %443 = vmatmul.mubr.f32.gmra.mrb[10].mxu1 %v268_v7 }
  0x93   : > { %407 = vmatprep.mubr.f32.mxu0 %v255_v8  ;;  %447 = vmatprep.mubr.f32.mxu1 %v271_v9 }
  0x96   : > { %408 = vmatmul.mubr.f32.gmra.mrb[12].mxu0 %v254_v10  ;;  %448 = vmatmul.mubr.f32.gmra.mrb[12].mxu1 %v270_v11 }
  0x97   : > { %412 = vmatprep.mubr.f32.mxu0 %v257_v12  ;;  %452 = vmatprep.mubr.f32.mxu1 %v273_v13 }
  0x9a   : > { %413 = vmatmul.mubr.f32.gmra.mrb[14].mxu0 %v256_v14  ;;  %453 = vmatmul.mubr.f32.gmra.mrb[14].mxu1 %v272_v15 }
 0x151   : > { %v644_v16 = vpop.f32.mrb[0].mxu0  ;;  %v668_v17 = vpop.f32.mrb[0].mxu1 }
 0x152   : > { %v645_v19 = vpop.f32.mrb[1].mxu0  ;;  %v669_v20 = vpop.f32.mrb[1].mxu1 }
 0x153   : > { %v646_v21 = vadd.f32 %v645_v19, %v644_v16  ;;  %v670_v22 = vadd.f32 %v669_v20, %v668_v17 }
 0x155   : > { %v380_v23 = vadd.f32 %v646_v21, %v1195_v18  ;;  %v420_v24 = vadd.f32 %v670_v22, %v1195_v18  ;;  %v647_v25 = vpop.f32.mrb[2].mxu0  ;;  %v671_v26 = vpop.f32.mrb[2].mxu1 }
 0x156   : > { %v648_v27 = vpop.f32.mrb[3].mxu0  ;;  %v672_v28 = vpop.f32.mrb[3].mxu1 }
 0x157   : > { %458 = vst [vmem:[%s1199_s11] sm:$0xff] %v380_v23  ;;  %466 = vst [vmem:[%s1199_s11 + $0x40] sm:$0xff] %v420_v24  ;;  %v649_v29 = vadd.f32 %v648_v27, %v647_v25  ;;  %v673_v30 = vadd.f32 %v672_v28, %v671_v26 }
 0x159   : > { %v385_v31 = vadd.f32 %v649_v29, %v1195_v18  ;;  %v425_v32 = vadd.f32 %v673_v30, %v1195_v18  ;;  %v650_v33 = vpop.f32.mrb[4].mxu0  ;;  %v674_v34 = vpop.f32.mrb[4].mxu1 }
 0x15a   : > { %v651_v35 = vpop.f32.mrb[5].mxu0  ;;  %v675_v36 = vpop.f32.mrb[5].mxu1 }
 0x15b   : > { %459 = vst [vmem:[%s1199_s11 + $0x8] sm:$0xff] %v385_v31  ;;  %467 = vst [vmem:[%s1199_s11 + $0x48] sm:$0xff] %v425_v32  ;;  %v652_v37 = vadd.f32 %v651_v35, %v650_v33  ;;  %v676_v38 = vadd.f32 %v675_v36, %v674_v34 }
 0x15d   : > { %v390_v39 = vadd.f32 %v652_v37, %v1195_v18  ;;  %v430_v40 = vadd.f32 %v676_v38, %v1195_v18  ;;  %v653_v41 = vpop.f32.mrb[6].mxu0  ;;  %v677_v42 = vpop.f32.mrb[6].mxu1 }
 0x15e   : > { %v654_v43 = vpop.f32.mrb[7].mxu0  ;;  %v678_v44 = vpop.f32.mrb[7].mxu1 }
 0x15f   : > { %460 = vst [vmem:[%s1199_s11 + $0x10] sm:$0xff] %v390_v39  ;;  %468 = vst [vmem:[%s1199_s11 + $0x50] sm:$0xff] %v430_v40  ;;  %v655_v45 = vadd.f32 %v654_v43, %v653_v41  ;;  %v679_v46 = vadd.f32 %v678_v44, %v677_v42 }
 0x161   : > { %v395_v47 = vadd.f32 %v655_v45, %v1195_v18  ;;  %v435_v48 = vadd.f32 %v679_v46, %v1195_v18  ;;  %v656_v49 = vpop.f32.mrb[8].mxu0  ;;  %v680_v50 = vpop.f32.mrb[8].mxu1 }
 0x162   : > { %v657_v51 = vpop.f32.mrb[9].mxu0  ;;  %v681_v52 = vpop.f32.mrb[9].mxu1 }
 0x163   : > { %461 = vst [vmem:[%s1199_s11 + $0x18] sm:$0xff] %v395_v47  ;;  %469 = vst [vmem:[%s1199_s11 + $0x58] sm:$0xff] %v435_v48  ;;  %v658_v53 = vadd.f32 %v657_v51, %v656_v49  ;;  %v682_v54 = vadd.f32 %v681_v52, %v680_v50 }
 0x165   : > { %v400_v55 = vadd.f32 %v658_v53, %v1195_v18  ;;  %v440_v56 = vadd.f32 %v682_v54, %v1195_v18  ;;  %v659_v57 = vpop.f32.mrb[10].mxu0  ;;  %v683_v58 = vpop.f32.mrb[10].mxu1 }
 0x166   : > { %v660_v59 = vpop.f32.mrb[11].mxu0  ;;  %v684_v60 = vpop.f32.mrb[11].mxu1 }
 0x167   : > { %462 = vst [vmem:[%s1199_s11 + $0x20] sm:$0xff] %v400_v55  ;;  %470 = vst [vmem:[%s1199_s11 + $0x60] sm:$0xff] %v440_v56  ;;  %v661_v61 = vadd.f32 %v660_v59, %v659_v57  ;;  %v685_v62 = vadd.f32 %v684_v60, %v683_v58 }
 0x169   : > { %v405_v63 = vadd.f32 %v661_v61, %v1195_v18  ;;  %v445_v0 = vadd.f32 %v685_v62, %v1195_v18  ;;  %v662_v1 = vpop.f32.mrb[12].mxu0  ;;  %v686_v2 = vpop.f32.mrb[12].mxu1 }
 0x16a   : > { %v663_v3 = vpop.f32.mrb[13].mxu0  ;;  %v687_v4 = vpop.f32.mrb[13].mxu1 }
 0x16b   : > { %463 = vst [vmem:[%s1199_s11 + $0x28] sm:$0xff] %v405_v63  ;;  %471 = vst [vmem:[%s1199_s11 + $0x68] sm:$0xff] %v445_v0  ;;  %v664_v5 = vadd.f32 %v663_v3, %v662_v1  ;;  %v688_v6 = vadd.f32 %v687_v4, %v686_v2 }
 0x16d   : > { %v410_v7 = vadd.f32 %v664_v5, %v1195_v18  ;;  %v450_v8 = vadd.f32 %v688_v6, %v1195_v18  ;;  %v665_v9 = vpop.f32.mrb[14].mxu0  ;;  %v689_v10 = vpop.f32.mrb[14].mxu1 }
 0x16e   : > { %v666_v11 = vpop.f32.mrb[15].mxu0  ;;  %v690_v12 = vpop.f32.mrb[15].mxu1 }
 0x16f   : > { %464 = vst [vmem:[%s1199_s11 + $0x30] sm:$0xff] %v410_v7  ;;  %472 = vst [vmem:[%s1199_s11 + $0x70] sm:$0xff] %v450_v8  ;;  %v667_v13 = vadd.f32 %v666_v11, %v665_v9  ;;  %v691_v14 = vadd.f32 %v690_v12, %v689_v10 }
 0x171   : > { %v415_v15 = vadd.f32 %v667_v13, %v1195_v18  ;;  %v455_v16 = vadd.f32 %v691_v14, %v1195_v18 }
 0x173   : > { %465 = vst [vmem:[%s1199_s11 + $0x38] sm:$0xff] %v415_v15  ;;  %473 = vst [vmem:[%s1199_s11 + $0x78] sm:$0xff] %v455_v16 }
 0x174   : > { %892 = shalt.err (!%p889_p12)
}
 0x175   : > { %s893_s4 = scalar_lea.hbm %s1232_s15, 2048  ;;  %s897_s25 = scalar_lea.hbm %s1289_s3, 6144 }
 0x176   : > { %p894_p2 = scmp.ne.s32.totalorder %s1232_s15, %s893_s4  ;;  %p898_p1 = scmp.lt.u32.totalorder %s1232_s15, %s1289_s3 }
 0x177   : > { %p899_p8 = scmp.lt.u32.totalorder %s897_s25, %s893_s4  ;;  %p901_p11 = scmp.lt.u32.totalorder %s893_s4, %s1232_s15 }
 0x178   : > { %p895_p7 = pnand %p894_p2, %p1308_p4 }
 0x179   : > { %p900_p9 = por %p899_p8, %p898_p1 }
 0x17a   : > { %p896_p10 = pneg %p895_p7 }
 0x17b   : > { %p902_p13 = por %p901_p11, %p900_p9 }
 0x17d   : > { %p903_p0 = pnand %p902_p13, %p896_p10 }
 0x17f   : > { %906 = shalt.err (!%p903_p0)
}
 0x180   : > { %s975_s11 = smov 128   ;;  %s976_s19 = smov 384  }
 0x181   : > { %s977_s10 = smov 8  }
 0x182   : > { %746 = dma.vmem_to_hbm [thread:$0]  (%p1308_p4), %s1234_s5, 2048, %s1232_s15, %s475_s21, %s975_s11, %s976_s19, %s977_s10  }
 0x183 PF: > { %p763_p5 = scmp.ge.s32.totalorder %s965_s17, 2  ;;  %s505_s27 = sand.u32 1, %s945_s12  }
 0x184   : > { %p1309_p3 = scmp.ne.s32.totalorder %s1300_s24, 0  ;;  %s506_s26 = scalar_lea.sflag [#allocation4], %s505_s27 }
 0x186   : > { %p757_p6 = pnand %p763_p5, %p1309_p3 }
 0x188   : > { %940 = dma.done.wait (!%p757_p6), %s506_s26, 2048  }
 0x189   : > { %942 = vsyncadd (!%p757_p6), %s506_s26, 4294965248  ;;  %s20_s17 = sadd.s32 1, %s965_s17   ;;  %s1310_s12 = smov %s949_s13 }
 0x18a   : > { %p17_p12 = scmp.ge.s32.totalorder %s20_s17, 5   ;;  %s1311_s13 = smov %s953_s14 }
 0x18b   : > { %s1312_s14 = smov %s1108_s18  ;;  %s1313_s15 = smov %s961_s16 }
 0x18c   : > { %s1314_s16 = smov %s1316_s30  ;;  %19 = sbr.rel (!%p17_p12) target bundleno = 7 (0x7), region = 86 }
 0x193   :  { %511 = vsyncpa [#allocation3], 1 }
 0x194   :  { %513 = vsyncpa [#allocation3 + $0x1], 1 }
 0x195   :  { %514 = vsyncpa [#allocation6], 1 }
 0x196   :  { %516 = vsyncpa [#allocation6 + $0x1], 1 }
 0x197   :  { %517 = vsyncpa [#allocation4], 1 }
 0x198   :  { %519 = vsyncpa [#allocation4 + $0x1], 1 }

</bundles_post_ra>
